<compile_context>
chip_gen: v7x
topology: tpu7x:2x2x1
jax: 0.10.0
libtpu: 0.0.40
codegen_flags: <defaults>
</compile_context>

<pallas_src>
import functools

import jax
import jax.numpy as jnp
from jax import lax
from jax.experimental import pallas as pl
from jax.experimental.pallas import tpu as pltpu

_LANE = 128
_MAX_TILE_C = 2048           # lane extent per block (multiple of 128)
_FOLD_C = 1024               # lane extent used when re-folding flat inputs
_CHUNK_F32_BYTES = 64 * 1024  # target f32 bytes per streamed row chunk
_MEGACORE_MIN_BYTES = 1 << 20  # force >=2 row blocks above this (v7x: 2 TCs)


def _cdiv(a, b):
    return -(-a // b)


def _round_up(x, m):
    return _cdiv(x, m) * m


def _round_down(x, m):
    return (x // m) * m


def _vmem_capacity_bytes():
    try:
        return int(pltpu.get_tpu_info().vmem_capacity_bytes)
    except Exception:
        return 64 << 20      # conservative fallback (v7x per-TC VMEM)


def _margin_partial_kernel(pos_ref, neg_ref, out_ref, *, margin, rows, cols,
                           chunk_r, n_chunks, mask_rows, mask_cols):
    """One (tile_r, tile_c) block -> accumulate a lane-dense (8,128) f32 partial."""
    tile_r, tile_c = pos_ref.shape
    i = pl.program_id(0)      # row-block index ("parallel")
    j = pl.program_id(1)      # col-block index ("arbitrary" reduction)

    @pl.when(j == 0)
    def _():
        out_ref[...] = jnp.zeros_like(out_ref)

    row0 = i * tile_r
    col0 = j * tile_c

    def chunk_body(k, acc):
        start = pl.multiple_of(k * chunk_r, chunk_r)
        pos = pos_ref[pl.ds(start, chunk_r), :].astype(jnp.float32)
        neg = neg_ref[pl.ds(start, chunk_r), :].astype(jnp.float32)
        hinge = jnp.maximum(margin - pos + neg, 0.0)      # clamp(..., min=0)
        if mask_rows:  # static flag: only traced when the row edge is ragged
            rid = lax.broadcasted_iota(jnp.int32, (chunk_r, tile_c), 0)
            hinge = jnp.where(rid + (row0 + start) < rows, hinge, 0.0)
        # Fold the chunk's rows into 8 sublanes with tile-aligned static slices
        # (pure VALU adds, no reshape, no cross-lane work).
        if chunk_r == 8:
            part = hinge
        else:
            part = hinge[0:8, :]
            for g in range(1, chunk_r // 8):
                part = part + hinge[g * 8:(g + 1) * 8, :]
        return acc + part

    acc = lax.fori_loop(0, n_chunks, chunk_body,
                        jnp.zeros((8, tile_c), jnp.float32))

    if mask_cols:  # static flag: applied once per block, after the row fold
        cid = lax.broadcasted_iota(jnp.int32, (8, tile_c), 1)
        acc = jnp.where(cid + col0 < cols, acc, 0.0)

    # Fold 128-lane groups with lane-aligned static slices (VALU adds).
    partial = acc[:, 0:_LANE]
    for g in range(1, tile_c // _LANE):
        partial = partial + acc[:, g * _LANE:(g + 1) * _LANE]

    out_ref[...] += partial   # lane-dense (8, 128) output slab per row block


def margin_ranking_loss(positive_similarity, negative_similarity, margin=1.0,
                        *, block_bytes=None, vmem_limit_bytes=None):
    """Mean-aggregated margin ranking loss via a tiled Pallas reduction kernel."""
    assert positive_similarity.shape == negative_similarity.shape
    margin = float(margin)
    orig_n = int(positive_similarity.size)

    pos = jnp.asarray(positive_similarity)
    neg = jnp.asarray(negative_similarity)
    # Integer inputs would make "hinge-zero" padding / masking unsafe; compute
    # in f32 like torch does once a float margin is involved.
    if not jnp.issubdtype(pos.dtype, jnp.floating):
        pos = pos.astype(jnp.float32)
    if not jnp.issubdtype(neg.dtype, jnp.floating):
        neg = neg.astype(jnp.float32)
    dtype = jnp.promote_types(pos.dtype, neg.dtype)
    pos, neg = pos.astype(dtype), neg.astype(dtype)
    itemsize = jnp.dtype(dtype).itemsize
    sub = max(8, 32 // itemsize)          # native sublane tile: 8 f32, 16 bf16

    # ---- shape to 2-D (R, C); re-fold wide flat inputs to a dense lane extent ----
    if pos.ndim <= 1:
        pos2, neg2 = pos.reshape(1, -1), neg.reshape(1, -1)
    else:
        pos2 = pos.reshape(-1, pos.shape[-1])
        neg2 = neg.reshape(-1, neg.shape[-1])
    R, C = pos2.shape
    if R == 1 and C > 2 * _FOLD_C:
        # A (1, N) block wastes 7/8 sublanes and forces tiny tiles; re-fold to
        # (N_pad/_FOLD_C, _FOLD_C).  Pad values give a hinge of exactly 0
        # (margin - (margin+1) + 0 = -1 -> clamp -> 0), so the sum is unchanged.
        n_pad = _round_up(C, _FOLD_C * sub)
        pos2 = jnp.pad(pos2.reshape(-1), (0, n_pad - C),
                       constant_values=margin + 1.0).reshape(-1, _FOLD_C)
        neg2 = jnp.pad(neg2.reshape(-1), (0, n_pad - C),
                       constant_values=0.0).reshape(-1, _FOLD_C)
        R, C = pos2.shape

    # ---- column tiling (reduction axis; usually a single block) ----
    tile_c = min(_round_up(C, _LANE), _MAX_TILE_C)
    nc = _cdiv(C, tile_c)
    mask_cols = (C % tile_c) != 0

    # ---- row chunking (streamed inside the kernel) and block sizing ----
    chunk_r = _round_down(max(_CHUNK_F32_BYTES // (tile_c * 4), sub), sub)
    chunk_r = max(sub, min(chunk_r, 256))

    vmem_cap = _vmem_capacity_bytes()
    if block_bytes is None:
        # ~1/8 of VMEM per input block: 8 MiB on v7x (64 MiB/TC), 16 MiB on
        # v5e/v6e (128 MiB).  2 inputs x 2 pipeline buffers ~= half of VMEM.
        block_bytes = max(1 << 20, min(vmem_cap // 8, 16 << 20))

    want_rows = max(chunk_r, block_bytes // (tile_c * itemsize))
    tile_r = max(chunk_r, _round_down(want_rows, chunk_r))
    tile_r = min(tile_r, _round_up(R, chunk_r))
    # Guarantee >=2 row blocks on large inputs so the "parallel" axis can shard
    # across both v7x TensorCores (costs one extra ~0.35us step elsewhere).
    if R > chunk_r and R * C * itemsize >= _MEGACORE_MIN_BYTES:
        tile_r = min(tile_r, _round_up(_cdiv(R, 2), chunk_r))
    nr = _cdiv(R, tile_r)
    n_chunks = tile_r // chunk_r
    mask_rows = (R % tile_r) != 0

    if vmem_limit_bytes is None:
        need = 4 * tile_r * tile_c * itemsize + (8 << 20)   # 2 inputs x 2 bufs + slack
        vmem_limit_bytes = min(vmem_cap - (8 << 20), max(32 << 20, need))

    kernel = functools.partial(
        _margin_partial_kernel, margin=margin, rows=R, cols=C,
        chunk_r=chunk_r, n_chunks=n_chunks,
        mask_rows=mask_rows, mask_cols=mask_cols)

    cost = pl.CostEstimate(
        flops=3 * R * C,                   # sub, add, max per element
        transcendentals=0,
        bytes_accessed=2 * R * C * itemsize + nr * 8 * _LANE * 4)

    partials = pl.pallas_call(
        kernel,
        out_shape=jax.ShapeDtypeStruct((nr * 8, _LANE), jnp.float32),
        grid=(nr, nc),
        in_specs=[pl.BlockSpec((tile_r, tile_c), lambda i, j: (i, j)),
                  pl.BlockSpec((tile_r, tile_c), lambda i, j: (i, j))],
        out_specs=pl.BlockSpec((8, _LANE), lambda i, j: (i, 0)),
        compiler_params=pltpu.CompilerParams(
            dimension_semantics=("parallel", "arbitrary"),
            vmem_limit_bytes=int(vmem_limit_bytes)),
        cost_estimate=cost,
    )(pos2, neg2)

    # Tiny final reduction + mean (over the ORIGINAL element count) in plain JAX.
    return jnp.sum(partials) / jnp.float32(orig_n)


if __name__ == "__main__":
    key = jax.random.PRNGKey(0)
    k = jax.random.split(key, 8)

    def reference(p, n, m):
        return jnp.mean(jnp.maximum(
            m - p.astype(jnp.float32) + n.astype(jnp.float32), 0.0))

    # Case 1: typical similarity matrices [batch=16, num_candidates=256], f32.
    pos = jax.random.normal(k[0], (16, 256), jnp.float32)
    neg = jax.random.normal(k[1], (16, 256), jnp.float32)
    out = jax.block_until_ready(margin_ranking_loss(pos, neg, 1.0))
    assert jnp.allclose(out, reference(pos, neg, 1.0), atol=1e-5, rtol=1e-5)

    # Case 2: misaligned shape -> in-kernel ragged-edge masking (no jnp.pad copy).
    pos = jax.random.normal(k[2], (5, 37), jnp.float32)
    neg = jax.random.normal(k[3], (5, 37), jnp.float32)
    out = jax.block_until_ready(margin_ranking_loss(pos, neg, 0.5))
    assert jnp.allclose(out, reference(pos, neg, 0.5), atol=1e-5, rtol=1e-5)

    # Case 3: wide rows -> column grid axis (reduction) + ragged lane masking.
    pos = jax.random.normal(k[4], (8, 2560), jnp.float32)
    neg = jax.random.normal(k[5], (8, 2560), jnp.float32)
    out = jax.block_until_ready(margin_ranking_loss(pos, neg, 1.0))
    assert jnp.allclose(out, reference(pos, neg, 1.0), atol=1e-5, rtol=1e-5)

    # Case 4: bf16 inputs + tiny block budget -> multi row-block parallel grid
    # and a multi-chunk streamed inner loop.
    pos = jax.random.normal(k[6], (256, 256), jnp.bfloat16)
    neg = jax.random.normal(k[7], (256, 256), jnp.bfloat16)
    out = jax.block_until_ready(
        margin_ranking_loss(pos, neg, 1.0, block_bytes=64 * 1024))
    assert jnp.allclose(out, reference(pos, neg, 1.0), atol=1e-3, rtol=1e-3)

    print("KERNEL_OK")
</pallas_src>

<mosaic_0001>
module attributes {stable_mosaic.version = 11 : i64} {
  func.func @_margin_partial_kernel(%arg0: i32, %arg1: i32, %arg2: memref<64x256xf32, #tpu.memory_space<vmem>>, %arg3: memref<64x256xf32, #tpu.memory_space<vmem>>, %arg4: memref<8x128xf32, #tpu.memory_space<vmem>>) attributes {dimension_semantics = [#tpu.dimension_semantics<parallel>, #tpu.dimension_semantics<arbitrary>], iteration_bounds = array<i64: 1, 1>, scalar_prefetch = 0 : i64, scratch_operands = 0 : i64, tpu.core_type = #tpu.core_type<tc>, window_params = [{transform_indices = @transform_0, window_bounds = array<i64: 64, 256>}, {transform_indices = @transform_1, window_bounds = array<i64: 64, 256>}, {transform_indices = @transform_2, window_bounds = array<i64: 8, 128>}]} {
    %c0_i32 = arith.constant 0 : i32
    %0 = arith.cmpi eq, %arg1, %c0_i32 : i32
    %1 = arith.extui %0 : i1 to i32
    %c0_i32_0 = arith.constant 0 : i32
    %2 = arith.cmpi ne, %1, %c0_i32_0 : i32
    scf.if %2 {
      %cst_11 = arith.constant 0.000000e+00 : f32
      %46 = vector.broadcast %cst_11 : f32 to vector<8x128xf32>
      %c0_12 = arith.constant 0 : index
      %c0_13 = arith.constant 0 : index
      %47 = vector.load %arg4[%c0_12, %c0_13] : memref<8x128xf32, #tpu.memory_space<vmem>>, vector<8x128xf32>
      tpu.vector_store %arg4[%c0_12, %c0_13], %46 {strides = array<i32>} : memref<8x128xf32, #tpu.memory_space<vmem>>, vector<8x128xf32>,
    } else {
    }
    %c64_i32 = arith.constant 64 : i32
    %3 = arith.muli %arg0, %c64_i32 : i32
    %cst = arith.constant 0.000000e+00 : f32
    %4 = vector.broadcast %cst : f32 to vector<8x256xf32>
    %c0_i32_1 = arith.constant 0 : i32
    %c64_i32_2 = arith.constant 64 : i32
    %5 = arith.muli %c0_i32_1, %c64_i32_2 : i32
    %6 = tpu.assume_multiple %5, 64 : i32
    %7 = arith.index_cast %6 : i32 to index
    %c0 = arith.constant 0 : index
    %8 = vector.load %arg2[%7, %c0] : memref<64x256xf32, #tpu.memory_space<vmem>>, vector<64x256xf32>
    %9 = arith.index_cast %6 : i32 to index
    %c0_3 = arith.constant 0 : index
    %10 = vector.load %arg3[%9, %c0_3] : memref<64x256xf32, #tpu.memory_space<vmem>>, vector<64x256xf32>
    %cst_4 = arith.constant 1.000000e+00 : f32
    %11 = vector.broadcast %cst_4 : f32 to vector<64x256xf32>
    %12 = arith.subf %11, %8 : vector<64x256xf32>
    %13 = arith.addf %12, %10 : vector<64x256xf32>
    %cst_5 = arith.constant 0.000000e+00 : f32
    %14 = vector.broadcast %cst_5 : f32 to vector<64x256xf32>
    %15 = arith.maximumf %13, %14 : vector<64x256xf32>
    %16 = tpu.iota {dimensions = array<i32: 0>} : vector<64x256xi32>
    %17 = arith.addi %3, %6 : i32
    %18 = vector.broadcast %17 : i32 to vector<64x256xi32>
    %19 = arith.addi %16, %18 : vector<64x256xi32>
    %c16_i32 = arith.constant 16 : i32
    %20 = vector.broadcast %c16_i32 : i32 to vector<64x256xi32>
    %21 = arith.cmpi slt, %19, %20 : vector<64x256xi32>
    %cst_6 = arith.constant 0.000000e+00 : f32
    %22 = vector.broadcast %cst_6 : f32 to vector<64x256xf32>
    %23 = arith.select %21, %15, %22 : vector<64x256xi1>, vector<64x256xf32>
    %24 = vector.extract_strided_slice %23 {offsets = [0, 0], sizes = [8, 256], strides = [1, 1]} : vector<64x256xf32> to vector<8x256xf32>
    %25 = vector.extract_strided_slice %23 {offsets = [8, 0], sizes = [8, 256], strides = [1, 1]} : vector<64x256xf32> to vector<8x256xf32>
    %26 = arith.addf %24, %25 : vector<8x256xf32>
    %27 = vector.extract_strided_slice %23 {offsets = [16, 0], sizes = [8, 256], strides = [1, 1]} : vector<64x256xf32> to vector<8x256xf32>
    %28 = arith.addf %26, %27 : vector<8x256xf32>
    %29 = vector.extract_strided_slice %23 {offsets = [24, 0], sizes = [8, 256], strides = [1, 1]} : vector<64x256xf32> to vector<8x256xf32>
    %30 = arith.addf %28, %29 : vector<8x256xf32>
    %31 = vector.extract_strided_slice %23 {offsets = [32, 0], sizes = [8, 256], strides = [1, 1]} : vector<64x256xf32> to vector<8x256xf32>
    %32 = arith.addf %30, %31 : vector<8x256xf32>
    %33 = vector.extract_strided_slice %23 {offsets = [40, 0], sizes = [8, 256], strides = [1, 1]} : vector<64x256xf32> to vector<8x256xf32>
    %34 = arith.addf %32, %33 : vector<8x256xf32>
    %35 = vector.extract_strided_slice %23 {offsets = [48, 0], sizes = [8, 256], strides = [1, 1]} : vector<64x256xf32> to vector<8x256xf32>
    %36 = arith.addf %34, %35 : vector<8x256xf32>
    %37 = vector.extract_strided_slice %23 {offsets = [56, 0], sizes = [8, 256], strides = [1, 1]} : vector<64x256xf32> to vector<8x256xf32>
    %38 = arith.addf %36, %37 : vector<8x256xf32>
    %39 = arith.addf %4, %38 : vector<8x256xf32>
    %c1_i32 = arith.constant 1 : i32
    %40 = vector.extract_strided_slice %39 {offsets = [0, 0], sizes = [8, 128], strides = [1, 1]} : vector<8x256xf32> to vector<8x128xf32>
    %41 = vector.extract_strided_slice %39 {offsets = [0, 128], sizes = [8, 128], strides = [1, 1]} : vector<8x256xf32> to vector<8x128xf32>
    %42 = arith.addf %40, %41 : vector<8x128xf32>
    %c0_7 = arith.constant 0 : index
    %c0_8 = arith.constant 0 : index
    %43 = vector.load %arg4[%c0_7, %c0_8] : memref<8x128xf32, #tpu.memory_space<vmem>>, vector<8x128xf32>
    %44 = arith.addf %43, %42 : vector<8x128xf32>
    %c0_9 = arith.constant 0 : index
    %c0_10 = arith.constant 0 : index
    %45 = vector.load %arg4[%c0_9, %c0_10] : memref<8x128xf32, #tpu.memory_space<vmem>>, vector<8x128xf32>
    tpu.vector_store %arg4[%c0_9, %c0_10], %44 {strides = array<i32>} : memref<8x128xf32, #tpu.memory_space<vmem>>, vector<8x128xf32>,
    return
  }
  func.func @transform_0(%arg0: i32, %arg1: i32) -> (i32, i32) {
    %c0_i32 = arith.constant 0 : i32
    return %arg0, %arg1 : i32, i32
  }
  func.func @transform_1(%arg0: i32, %arg1: i32) -> (i32, i32) {
    %c0_i32 = arith.constant 0 : i32
    return %arg0, %arg1 : i32, i32
  }
  func.func @transform_2(%arg0: i32, %arg1: i32) -> (i32, i32) {
    %c0_i32 = arith.constant 0 : i32
    %c0_i32_0 = arith.constant 0 : i32
    return %arg0, %c0_i32 : i32, i32
  }
}

</mosaic_0001>

<bundles_post_ra>
// kernel: tpu_custom_call.1
= control target key start
LH: loop header
LB: loop body
LE: loop exit
PB: predicated region body
PF: predicated region fallthrough
CT: control target
= control target key end

     0   :  { %7 = vsyncpa [#allocation3], 0  ;;  %s344_s0 = inlined_call_operand.hbm [shape: f32[16,256], index: 0, kind: input, shape index: {}]   ;;  %s345_s1 = inlined_call_operand.hbm [shape: f32[16,256], index: 1, kind: input, shape index: {}]   ;;  %s346_s2 = inlined_call_operand.hbm [shape: f32[8,128], index: 2, kind: output, shape index: {}]  }
   0x1   :  { %8 = vsyncpa [#allocation6], 0 }
   0x2   :  { %9 = vsyncpa [#allocation4], 0 }
   0x3   :  { %14 = vsyncadd [#allocation3], 1536  ;;  %s288_s9 = smov [#allocation2]   ;;  %s216_s13 = scalar_lea.hbm %s344_s0, 512 }
   0x4   :  { %s15_s10 = sshll.u32 %s288_s9, 4  ;;  %p217_p0 = scmp.ne.s32.totalorder %s344_s0, %s216_s13  ;;  %s16_s10 = int_to_ptr.vmem [resolvable:$true] %s15_s10 }
   0x5   :  { %p220_p1 = scmp.lt.u32.totalorder %s216_s13, %s344_s0 }
   0x7   :  { %p222_p2 = pnand %p220_p1, %p217_p0 }
   0x9   :  { %225 = shalt.err (!%p222_p2)
}
   0xa   :  { %s226_s18 = scalar_lea.vmem %s16_s10, 512  ;;  %s230_s19 = scalar_lea.vmem %s16_s10, 2048 }
   0xb   :  { %p227_p3 = scmp.ne.s32.totalorder %s16_s10, %s226_s18  ;;  %p231_p4 = scmp.lt.s32.totalorder %s16_s10, %s16_s10 }
   0xc   :  { %p232_p5 = scmp.lt.s32.totalorder %s230_s19, %s226_s18 }
   0xe   :  { %p233_p6 = por %p232_p5, %p231_p4 }
  0x10   :  { %p234_p7 = pnand %p233_p6, %p227_p3 }
  0x12   :  { %237 = shalt.err (!%p234_p7)
}
  0x13   :  { %s289_s20 = smov 256   ;;  %s290_s21 = smov 16  }
  0x14   :  { %21 = dma.hbm_to_vmem [thread:$0]  %s344_s0, 512, %s16_s10, [#allocation3], %s289_s20, %s289_s20, %s290_s21  }
  0x15   :  { %26 = vsyncadd [#allocation6], 1536  ;;  %s291_s24 = smov [#allocation5]   ;;  %s238_s28 = scalar_lea.hbm %s345_s1, 512 }
  0x16   :  { %s27_s25 = sshll.u32 %s291_s24, 4  ;;  %p239_p8 = scmp.ne.s32.totalorder %s345_s1, %s238_s28  ;;  %s28_s25 = int_to_ptr.vmem [resolvable:$true] %s27_s25 }
  0x17   :  { %p242_p9 = scmp.lt.u32.totalorder %s238_s28, %s345_s1 }
  0x19   :  { %p244_p10 = pnand %p242_p9, %p239_p8 }
  0x1b   :  { %247 = shalt.err (!%p244_p10)
}
  0x1c   :  { %s248_s5 = scalar_lea.vmem %s28_s25, 512  ;;  %s252_s0 = scalar_lea.vmem %s28_s25, 2048 }
  0x1d   :  { %p249_p11 = scmp.ne.s32.totalorder %s28_s25, %s248_s5  ;;  %p253_p12 = scmp.lt.s32.totalorder %s28_s25, %s28_s25 }
  0x1e   :  { %p254_p13 = scmp.lt.s32.totalorder %s252_s0, %s248_s5 }
  0x20   :  { %p255_p0 = por %p254_p13, %p253_p12 }
  0x22   :  { %p256_p1 = pnand %p255_p0, %p249_p11 }
  0x24   :  { %259 = shalt.err (!%p256_p1)
}
  0x25   :  { %33 = dma.hbm_to_vmem [thread:$0]  %s345_s1, 512, %s28_s25, [#allocation6], %s289_s20, %s289_s20, %s290_s21  }
  0x26   :  { %282 = dma.done.wait [#allocation3], 2048  }
  0x27   :  { %283 = vsyncadd [#allocation3], 4294965248 }
  0x28   :  { %284 = dma.done.wait [#allocation6], 2048  }
  0x29   :  { %285 = vsyncadd [#allocation6], 4294965248  ;;  %v49_v0 = vld [vmem:[#allocation2] sm:$0xff]  ;;  %v50_v1 = vld [vmem:[#allocation2 + $0x8] sm:$0xff]  ;;  %s292_s1 = smov [#allocation7]  }
  0x2a   :  { %v51_v2 = vld [vmem:[#allocation2 + $0x10] sm:$0xff]  ;;  %v52_v3 = vld [vmem:[#allocation2 + $0x18] sm:$0xff]  ;;  %v67_v4 = vld [vmem:[#allocation5] sm:$0xff]  ;;  %v83_v6 = vsub.f32 1.0, %v49_v0  ;;  %v84_v7 = vsub.f32 1.0, %v50_v1  ;;  %s200_s8 = sshll.u32 %s292_s1, 4  ;;  %s201_s8 = int_to_ptr.vmem [resolvable:$true] %s200_s8 }
  0x2b   :  { %v68_v5 = vld [vmem:[#allocation5 + $0x8] sm:$0xff]  ;;  %v85_v8 = vsub.f32 1.0, %v51_v2  ;;  %v69_v9 = vld [vmem:[#allocation5 + $0x10] sm:$0xff]  ;;  %v70_v10 = vld [vmem:[#allocation5 + $0x18] sm:$0xff]  ;;  %v86_v11 = vsub.f32 1.0, %v52_v3  ;;  %s260_s9 = scalar_lea.vmem %s201_s8, 128  ;;  %p265_p3 = scmp.lt.s32.totalorder %s201_s8, %s201_s8 }
  0x2c   :  { %v99_v12 = vadd.f32 %v83_v6, %v67_v4  ;;  %v100_v13 = vadd.f32 %v84_v7, %v68_v5  ;;  %p261_p2 = scmp.ne.s32.totalorder %s201_s8, %s260_s9  ;;  %p266_p4 = scmp.lt.s32.totalorder %s260_s9, %s260_s9 }
  0x2d   :  { %v101_v14 = vadd.f32 %v85_v8, %v69_v9  ;;  %v102_v15 = vadd.f32 %v86_v11, %v70_v10 }
  0x2e   :  { %v115_v16 = vmax.f32 %v99_v12, 0.0  ;;  %v116_v17 = vmax.f32 %v100_v13, 0.0  ;;  %p267_p5 = por %p266_p4, %p265_p3 }
  0x2f   :  { %v117_v18 = vmax.f32 %v101_v14, 0.0  ;;  %v118_v19 = vmax.f32 %v102_v15, 0.0 }
  0x30   :  { %p268_p6 = pnand %p267_p5, %p261_p2 }
  0x31   :  { %v174_v20 = vadd.f32 %v117_v18, %v115_v16  ;;  %v175_v21 = vadd.f32 %v118_v19, %v116_v17 }
  0x33   :  { %v190_v22 = vadd.f32 %v175_v21, %v174_v20 }
  0x35   :  { %193 = vst [vmem:[#allocation7] sm:$0xff] %v190_v22 }
  0x36   :  { %271 = shalt.err (!%p268_p6)
}
  0x37   :  { %s272_s12 = scalar_lea.hbm %s346_s2, 128 }
  0x38   :  { %p273_p7 = scmp.ne.s32.totalorder %s346_s2, %s272_s12  ;;  %p276_p8 = scmp.lt.u32.totalorder %s272_s12, %s346_s2 }
  0x3a   :  { %p278_p9 = pnand %p276_p8, %p273_p7 }
  0x3c   :  { %281 = shalt.err (!%p278_p9)
}
  0x3d   :  { %203 = dma.vmem_to_hbm [thread:$0]  %s201_s8, 128, %s346_s2, [#allocation4]  }
  0x3e   :  { %286 = dma.done.wait [#allocation4], 128  }
  0x3f   :  { %287 = vsyncadd [#allocation4], 4294967168 }
  0x40   :  { %207 = vsyncpa [#allocation3], 1 }
  0x41   :  { %208 = vsyncpa [#allocation6], 1 }
  0x42   :  { %209 = vsyncpa [#allocation4], 1 }

</bundles_post_ra>
